<compile_context>
chip_gen: v7x
topology: tpu7x:2x2x1
jax: 0.10.0
libtpu: 0.0.40
codegen_flags: <defaults>
</compile_context>

<pallas_src>
import functools

import jax
import jax.numpy as jnp
from jax.experimental import pallas as pl
from jax.experimental.pallas import tpu as pltpu

BN_EPS = 1e-6
TARGET_BLOCK_BYTES = 6 << 20      # ~6 MiB of y per block (flat part of HBM roofline)
VMEM_LIMIT_FLOOR = 32 << 20       # never request less than the v6e/v7x default
VMEM_LIMIT_CAP = 48 << 20         # stay well under v7x's 64 MiB physical VMEM


# ------------------------------ kernel ------------------------------------- #
def _fcu_up_fused_kernel(x_ref, w_ref, b_ref, y_ref, o_ref, *, rep):
    """Fused 1x1x1 conv (BN folded) + ReLU + nearest W-upsample + residual add.

    x: (TM, Cin)        strided tokens for this row tile (matmul LHS layout)
    w: (Cin, WCt)       BN-folded weight, tiled to the minimal lane-dense width
    b: (1,  WCt)        BN-folded bias, same tiling
    y: (TM, H, W*Cout)  residual block (lane-dense last axis)
    o: (TM, H, W*Cout)  output block (aliased onto y in HBM)
    rep: static int == (W*Cout) // WCt, lane replication done in-kernel
    """
    x = x_ref[...].astype(jnp.float32)                                # (TM, Cin)
    z = jnp.dot(x, w_ref[...], preferred_element_type=jnp.float32)   # (TM, WCt)
    z = jnp.maximum(z + b_ref[...], 0.0)                              # bias+BN folded, ReLU
    if rep > 1:
        # Whole-128-lane replication (vreg copies only) completes the W upsample.
        z = jnp.tile(z, (1, rep))                                     # (TM, W*Cout)
    z = z.astype(o_ref.dtype)
    # Broadcast over H (sublane splat); add in y's dtype (bf16-native on v6e/v7x).
    o_ref[...] = y_ref[...] + z[:, None, :]


# --------------------------- parameter folding ----------------------------- #
def fcu_up_fold_params(params, *, up_stride, num_patches):
    """Fold eval-mode BatchNorm into the 1x1x1 conv and pre-tile the weight to
    the minimal lane-dense width.  Call ONCE at parameter-load time (hoisted
    off the per-forward critical path)."""
    w, b, gamma, beta, mean, var = params          # w: (Cout, Cin), rest: (Cout,)
    Cout, _ = w.shape
    W = int(num_patches * up_stride)

    f32 = lambda v: jnp.asarray(v, jnp.float32)
    scale = f32(gamma) * jax.lax.rsqrt(f32(var) + BN_EPS)             # (Cout,)
    w_fold = f32(w).T * scale[None, :]                                # (Cin, Cout)
    b_fold = (f32(b) - f32(mean)) * scale + f32(beta)                 # (Cout,)

    # Smallest repeat r (dividing W) whose width r*Cout is a multiple of 128:
    # the MXU then emits a lane-dense (TM, r*Cout) row and the kernel replicates
    # it W//r times.  Falls back to the full W tiling when W*Cout % 128 != 0
    # (still correct, but masked partial stores -- prefer padding Cout).
    r = W
    for cand in range(1, W + 1):
        if W % cand == 0 and (cand * Cout) % 128 == 0:
            r = cand
            break
    rep = W // r
    w_t = jnp.tile(w_fold, (1, r))                                    # (Cin, r*Cout)
    b_t = jnp.tile(b_fold, r).reshape(1, r * Cout)                    # (1,  r*Cout)
    return {"w_t": w_t, "b_t": b_t, "rep": rep, "cout": Cout}


# ------------------------------ tiling ------------------------------------- #
def _choose_row_tile(M, row_bytes, target_bytes=TARGET_BLOCK_BYTES):
    """Rows (of B*T) per block: ~target_bytes of y per block, sublane-aligned,
    >= 2 grid steps for non-trivial work (v7x's 2 TensorCores both get a share),
    preferring a tile that divides M (no masked tail block)."""
    tm = max(1, int(target_bytes) // max(1, int(row_bytes)))
    if M >= 2 and M * row_bytes >= (1 << 20):
        tm = min(tm, -(-M // 2))          # cdiv(M, 2): keep both TCs busy
    tm = min(tm, M)
    if M >= 8 and tm < M:
        tm = max(8, (tm // 8) * 8)        # sublane / MXU-LHS alignment
        lo = max(8, tm - max(8, tm // 4)) # search only slightly below the target
        cand = tm
        while cand >= lo:
            if M % cand == 0:
                tm = cand
                break
            cand -= 8
    return int(max(1, min(tm, M)))


# ------------------------------ wrapper ------------------------------------ #
def fcu_up_forward(x_r, y, folded, *, up_stride, down_ratio, num_patches):
    """Fused FCUUp forward.  `folded` comes from fcu_up_fold_params().
    y / output layout is channel-last: (B, T, H, W, Cout)."""
    if up_stride == 0.5:
        return x_r

    B, N, Cin = x_r.shape
    Cout = folded["cout"]
    rep = folded["rep"]
    w_t, b_t = folded["w_t"], folded["b_t"]
    WCt = w_t.shape[1]

    H = W = int(num_patches * up_stride)
    assert num_patches * up_stride == H, "num_patches * up_stride must be an integer"
    WC = W * Cout
    assert WCt * rep == WC

    # Conv3d(kernel=1, stride=(down_ratio,1,1)) == strided token select + 1x1 projection.
    x_sel = x_r[:, ::down_ratio, :]                 # (B, T, Cin)
    T = x_sel.shape[1]
    M = B * T
    assert y.shape == (B, T, H, W, Cout), (y.shape, (B, T, H, W, Cout))

    # Free (contiguous) reshapes only -- no dtype cast / extra copy of y.
    x2 = x_sel.reshape(M, Cin)
    y3 = y.reshape(M, H, WC)

    itemsize = y.dtype.itemsize
    row_bytes = H * WC * itemsize
    tm = _choose_row_tile(M, row_bytes)
    grid = (pl.cdiv(M, tm),)

    block_bytes = tm * row_bytes
    vmem_needed = (4 * block_bytes                              # double-buffered y-in + out
                   + 2 * tm * Cin * x2.dtype.itemsize           # double-buffered x tile
                   + (w_t.size + b_t.size) * 4                  # single-buffered constants
                   + (2 << 20))                                 # headroom / internal scratch
    vmem_limit = int(min(max(vmem_needed, VMEM_LIMIT_FLOOR), VMEM_LIMIT_CAP))

    cost = pl.CostEstimate(
        flops=int(2 * M * Cin * WCt),
        transcendentals=0,
        bytes_accessed=int(2 * M * row_bytes
                           + x2.size * x2.dtype.itemsize
                           + (w_t.size + b_t.size) * 4),
    )

    kernel = functools.partial(_fcu_up_fused_kernel, rep=rep)
    out3 = pl.pallas_call(
        kernel,
        out_shape=jax.ShapeDtypeStruct((M, H, WC), y.dtype),
        grid=grid,
        in_specs=[
            pl.BlockSpec((tm, Cin), lambda i: (i, 0)),              # tokens (MXU LHS layout)
            pl.BlockSpec((Cin, WCt), lambda i: (0, 0),              # folded weight: constant,
                         pipeline_mode=pl.Buffered(1)),             #   single-buffered in VMEM
            pl.BlockSpec((1, WCt), lambda i: (0, 0),                # folded bias: constant
                         pipeline_mode=pl.Buffered(1)),
            pl.BlockSpec((tm, H, WC), lambda i: (i, 0, 0)),         # residual y block
        ],
        out_specs=pl.BlockSpec((tm, H, WC), lambda i: (i, 0, 0)),
        input_output_aliases={3: 0},        # write in place over y (donate y to avoid a copy)
        compiler_params=pltpu.CompilerParams(
            dimension_semantics=("parallel",),
            vmem_limit_bytes=vmem_limit,
        ),
        cost_estimate=cost,
    )(x2, w_t, b_t, y3)

    return out3.reshape(B, T, H, W, Cout)


# ----------------------------- reference ----------------------------------- #
def fcu_up_reference(x_r, y, params, *, up_stride, down_ratio, num_patches):
    if up_stride == 0.5:
        return x_r
    w, b, gamma, beta, mean, var = params
    x_sel = x_r[:, ::down_ratio, :]                              # (B, T, Cin)
    z = jnp.einsum("btc,oc->bto", x_sel, w) + b                  # conv 1x1x1
    z = (z - mean) * jax.lax.rsqrt(var + BN_EPS) * gamma + beta  # BN (eval)
    z = jnp.maximum(z, 0.0)                                      # ReLU
    return y + z[:, :, None, None, :]                            # nearest upsample + add


# ------------------------------- main -------------------------------------- #
def _make_case(key, *, B, inplanes, outplanes, num_frames, down_ratio,
               up_stride, num_patches):
    N = num_frames
    T = (N - 1) // down_ratio + 1
    H = W = int(num_patches * up_stride)
    kx, ky, kw, kb, kg, kbeta, kmu, kvar = jax.random.split(key, 8)
    x_r = jax.random.normal(kx, (B, N, inplanes), jnp.float32)
    y = jax.random.normal(ky, (B, T, H, W, outplanes), jnp.float32)
    w = jax.random.normal(kw, (outplanes, inplanes), jnp.float32) * 0.1
    b = jax.random.normal(kb, (outplanes,), jnp.float32) * 0.1
    gamma = 1.0 + 0.1 * jax.random.normal(kg, (outplanes,), jnp.float32)
    beta = 0.1 * jax.random.normal(kbeta, (outplanes,), jnp.float32)
    mean = 0.1 * jax.random.normal(kmu, (outplanes,), jnp.float32)
    var = jnp.abs(jax.random.normal(kvar, (outplanes,), jnp.float32)) + 0.5
    params = (w, b, gamma, beta, mean, var)
    cfg = dict(up_stride=up_stride, down_ratio=down_ratio, num_patches=num_patches)
    return x_r, y, params, cfg


if __name__ == "__main__":
    key = jax.random.PRNGKey(0)
    k1, k2 = jax.random.split(key)

    cases = [
        # (a) main demo: W*Cout = 128, no in-kernel replication (rep = 1).
        _make_case(k1, B=2, inplanes=32, outplanes=16, num_frames=8,
                   down_ratio=2, up_stride=2, num_patches=4),
        # (b) wider spatial config: W*Cout = 256, exercises the in-kernel
        #     lane replication (rep = 2) of the minimal lane-dense matmul.
        _make_case(k2, B=2, inplanes=32, outplanes=16, num_frames=8,
                   down_ratio=1, up_stride=4, num_patches=4),
    ]

    for x_r, y, params, cfg in cases:
        # Reference first (the kernel is allowed to take y's buffer in place).
        ref = fcu_up_reference(x_r, y, params, **cfg)
        # BN fold + lane tiling done once, off the per-call path.
        folded = fcu_up_fold_params(params, up_stride=cfg["up_stride"],
                                    num_patches=cfg["num_patches"])
        out = jax.block_until_ready(fcu_up_forward(x_r, y, folded, **cfg))
        assert out.shape == ref.shape, (out.shape, ref.shape)
        err = float(jnp.max(jnp.abs(out - ref)))
        assert jnp.allclose(out, ref, atol=1e-4, rtol=1e-4), err

    print("KERNEL_OK")
</pallas_src>

<mosaic_0001>
module attributes {stable_mosaic.version = 11 : i64} {
  func.func @_fcu_up_fused_kernel(%arg0: i32, %arg1: memref<8x32xf32, #tpu.memory_space<vmem>>, %arg2: memref<32x128xf32, #tpu.memory_space<vmem>>, %arg3: memref<1x128xf32, #tpu.memory_space<vmem>>, %arg4: memref<8x8x128xf32, #tpu.memory_space<vmem>>, %arg5: memref<8x8x128xf32, #tpu.memory_space<vmem>>) attributes {dimension_semantics = [#tpu.dimension_semantics<parallel>], iteration_bounds = array<i64: 1>, scalar_prefetch = 0 : i64, scratch_operands = 0 : i64, tpu.core_type = #tpu.core_type<tc>, window_params = [{transform_indices = @transform_0, window_bounds = array<i64: 8, 32>}, {pipeline_mode = #tpu.pipeline_mode<synchronous>, transform_indices = @transform_1, window_bounds = array<i64: 32, 128>}, {pipeline_mode = #tpu.pipeline_mode<synchronous>, transform_indices = @transform_2, window_bounds = array<i64: 1, 128>}, {transform_indices = @transform_3, window_bounds = array<i64: 8, 8, 128>}, {transform_indices = @transform_4, window_bounds = array<i64: 8, 8, 128>}]} {
    %c0 = arith.constant 0 : index
    %c0_0 = arith.constant 0 : index
    %0 = vector.load %arg1[%c0, %c0_0] : memref<8x32xf32, #tpu.memory_space<vmem>>, vector<8x32xf32>
    %c0_1 = arith.constant 0 : index
    %c0_2 = arith.constant 0 : index
    %1 = vector.load %arg2[%c0_1, %c0_2] : memref<32x128xf32, #tpu.memory_space<vmem>>, vector<32x128xf32>
    %cst = arith.constant dense<0.000000e+00> : vector<8x128xf32>
    %2 = tpu.matmul %0, %1, %cst {dimension_numbers = #tpu.dot_dimension_numbers<[1], [0], [0], [1], [0, 0, 1, 1], [], []>} : vector<8x32xf32>, vector<32x128xf32>, vector<8x128xf32> -> vector<8x128xf32>
    %c0_3 = arith.constant 0 : index
    %c0_4 = arith.constant 0 : index
    %3 = vector.load %arg3[%c0_3, %c0_4] : memref<1x128xf32, #tpu.memory_space<vmem>>, vector<1x128xf32>
    %4 = vector.broadcast %3 : vector<1x128xf32> to vector<8x128xf32>
    %5 = arith.addf %2, %4 : vector<8x128xf32>
    %cst_5 = arith.constant 0.000000e+00 : f32
    %6 = vector.broadcast %cst_5 : f32 to vector<8x128xf32>
    %7 = arith.maximumf %5, %6 : vector<8x128xf32>
    %c0_6 = arith.constant 0 : index
    %c0_7 = arith.constant 0 : index
    %c0_8 = arith.constant 0 : index
    %8 = vector.load %arg4[%c0_6, %c0_7, %c0_8] : memref<8x8x128xf32, #tpu.memory_space<vmem>>, vector<8x8x128xf32>
    %9 = vector.shape_cast %7 : vector<8x128xf32> to vector<8x1x128xf32>
    %10 = vector.broadcast %9 : vector<8x1x128xf32> to vector<8x8x128xf32>
    %11 = arith.addf %8, %10 : vector<8x8x128xf32>
    %c0_9 = arith.constant 0 : index
    %c0_10 = arith.constant 0 : index
    %c0_11 = arith.constant 0 : index
    %12 = vector.load %arg5[%c0_9, %c0_10, %c0_11] : memref<8x8x128xf32, #tpu.memory_space<vmem>>, vector<8x8x128xf32>
    tpu.vector_store %arg5[%c0_9, %c0_10, %c0_11], %11 {strides = array<i32>} : memref<8x8x128xf32, #tpu.memory_space<vmem>>, vector<8x8x128xf32>,
    return
  }
  func.func @transform_0(%arg0: i32) -> (i32, i32) {
    %c0_i32 = arith.constant 0 : i32
    %c0_i32_0 = arith.constant 0 : i32
    return %arg0, %c0_i32 : i32, i32
  }
  func.func @transform_1(%arg0: i32) -> (i32, i32) {
    %c0_i32 = arith.constant 0 : i32
    %c0_i32_0 = arith.constant 0 : i32
    %c0_i32_1 = arith.constant 0 : i32
    return %c0_i32, %c0_i32_0 : i32, i32
  }
  func.func @transform_2(%arg0: i32) -> (i32, i32) {
    %c0_i32 = arith.constant 0 : i32
    %c0_i32_0 = arith.constant 0 : i32
    %c0_i32_1 = arith.constant 0 : i32
    return %c0_i32, %c0_i32_0 : i32, i32
  }
  func.func @transform_3(%arg0: i32) -> (i32, i32, i32) {
    %c0_i32 = arith.constant 0 : i32
    %c0_i32_0 = arith.constant 0 : i32
    %c0_i32_1 = arith.constant 0 : i32
    return %arg0, %c0_i32, %c0_i32_0 : i32, i32, i32
  }
  func.func @transform_4(%arg0: i32) -> (i32, i32, i32) {
    %c0_i32 = arith.constant 0 : i32
    %c0_i32_0 = arith.constant 0 : i32
    %c0_i32_1 = arith.constant 0 : i32
    return %arg0, %c0_i32, %c0_i32_0 : i32, i32, i32
  }
}

</mosaic_0001>

<bundles_post_ra>
// kernel: tpu_custom_call.1
= control target key start
LH: loop header
LB: loop body
LE: loop exit
PB: predicated region body
PF: predicated region fallthrough
CT: control target
= control target key end

     0   :  { %9 = vsyncpa [#allocation3], 0  ;;  %s411_s0 = inlined_call_operand.vmem [shape: f32[8,32], index: 0, kind: input, shape index: {}]   ;;  %s412_s1 = inlined_call_operand.vmem [shape: f32[32,128], index: 1, kind: input, shape index: {}]   ;;  %s413_s2 = inlined_call_operand.vmem [shape: f32[1,128], index: 2, kind: input, shape index: {}]   ;;  %s414_s3 = inlined_call_operand.hbm [shape: f32[8,8,128], index: 3, kind: input, shape index: {}, may-alias: {3,4}]   ;;  %s415_s4 = inlined_call_operand.hbm [shape: f32[8,8,128], index: 4, kind: output, shape index: {}, may-alias: {3,4}]  }
   0x1   :  { %10 = vsyncpa [#allocation4], 0  ;;  %s330_s15 = smov [#allocation2]   ;;  %s282_s19 = scalar_lea.hbm %s414_s3, 1024 }
   0x2   :  { %s22_s16 = sshll.u32 %s330_s15, 4  ;;  %p283_p0 = scmp.ne.s32.totalorder %s414_s3, %s282_s19  ;;  %s23_s16 = int_to_ptr.vmem [resolvable:$true] %s22_s16 }
   0x3   :  { %p286_p1 = scmp.lt.u32.totalorder %s282_s19, %s414_s3 }
   0x5   :  { %p288_p2 = pnand %p286_p1, %p283_p0 }
   0x7   :  { %291 = shalt.err (!%p288_p2)
}
   0x8   :  { %s292_s24 = scalar_lea.vmem %s23_s16, 1024  ;;  %p297_p4 = scmp.lt.s32.totalorder %s23_s16, %s23_s16 }
   0x9   :  { %p293_p3 = scmp.ne.s32.totalorder %s23_s16, %s292_s24  ;;  %p298_p5 = scmp.lt.s32.totalorder %s292_s24, %s292_s24 }
   0xb   :  { %p299_p6 = por %p298_p5, %p297_p4 }
   0xd   :  { %p300_p7 = pnand %p299_p6, %p293_p3 }
   0xf   :  { %303 = shalt.err (!%p300_p7)
}
  0x10   :  { %s331_s25 = smov 128   ;;  %s332_s26 = smov 8  }
  0x11   :  { %28 = dma.hbm_to_vmem [thread:$0]  %s414_s3, 1024, %s23_s16, [#allocation3], %s331_s25, %s331_s25, %s332_s26  }
  0x12   :  { %326 = dma.done.wait [#allocation3], 1024  }
  0x13   :  { %327 = vsyncadd [#allocation3], 4294966272  ;;  %v333_v0 = vmov 0.0|0.0   ;;  %vm334_vm0 = vmmov 0   ;;  %v335_v1 = vmov 0.0   ;;  %v33_v2 = vld [vmem:[%s412_s1] sm:$0xff]  ;;  %v132_v11 = vlaneseq }
  0x14   :  { %268 = vmatprep.subr.bf16.mxu0 %v333_v0  ;;  %265 = vmatprep.mubr.msk.f32.mxu0 %vm334_vm0, %v335_v1  ;;  %v34_v3 = vld [vmem:[%s412_s1 + $0x8] sm:$0xff]  ;;  %v35_v4 = vld [vmem:[%s412_s1 + $0x10] sm:$0xff]  ;;  %v36_v6 = vld [vmem:[%s412_s1 + $0x18] sm:$0xff]  ;;  %vm44_vm1 = vcmask 261120   ;;  %v336_v9 = vmov 1966171168  }
  0x15   :  { %v269_v5 = vpack.c.bf16 %v34_v3, %v33_v2  ;;  %v272_v7 = vpack.c.bf16 %v36_v6, %v35_v4  ;;  %v32_v8 = vld [vmem:[%s411_s0] sm:$0xff]  ;;  %v130_v10 = vunpack.c.l.s4 %v336_v9  ;;  %v133_v13 = vshrl.u32 %v132_v11, 7  ;;  %v120_v32 = vld [vmem:[#allocation2 + $0x8] sm:$0xff]  ;;  %v121_v33 = vld [vmem:[#allocation2 + $0x10] sm:$0xff]  ;;  %s337_s0 = smov [#allocation5]  }
  0x16   :  { %v250_v14 = vld [vmem:[%s413_s2] ss:$0 sm:$0xff]  ;;  %v122_v39 = vld [vmem:[#allocation2 + $0x18] sm:$0xff]  ;;  %v124_v40 = vld [vmem:[#allocation2 + $0x28] sm:$0xff]  ;;  %s238_s1 = sshll.u32 %s337_s0, 4  ;;  %s239_s1 = int_to_ptr.vmem [resolvable:$true] %s238_s1 }
  0x17   :  { %270 = vmatpush3.bf16.msra.mxu0 %v269_v5  ;;  %v131_v12 = vunpack.c.0.s8 %v130_v10  ;;  %v179_v22 = vsub.s32 0, %v133_v13  ;;  %v119_v26 = vld [vmem:[#allocation2] sm:$0xff]  ;;  %v125_v41 = vld [vmem:[#allocation2 + $0x30] sm:$0xff]  ;;  %v126_v49 = vld [vmem:[#allocation2 + $0x38] sm:$0xff]  ;;  %s304_s2 = scalar_lea.vmem %s239_s1, 1024  ;;  %p309_p9 = scmp.lt.s32.totalorder %s239_s1, %s239_s1 }
  0x18   :  { %271 = vmatprep.subr.bf16.mxu0 %v333_v0  ;;  %v123_v34 = vld [vmem:[#allocation2 + $0x20] sm:$0xff]  ;;  %p305_p8 = scmp.ne.s32.totalorder %s239_s1, %s304_s2  ;;  %p310_p10 = scmp.lt.s32.totalorder %s304_s2, %s304_s2 }
  0x19   :  { %v134_v17 = vsub.s32 %v131_v12, %v133_v13 }
  0x1a   :  { %p311_p11 = por %p310_p10, %p309_p9 }
  0x1b   :  { %273 = vmatpush3.bf16.msra.mxu0 %v272_v7 }
  0x1c   :  { %p312_p12 = pnand %p311_p11, %p305_p8 }
  0x1e   :  { %266 = vmatmul.mubr.msk.f32.vlgmr.msra.gmra.mrb[0].mxu0 %vm44_vm1, %v32_v8 }
  0xf1   :  { %v114_v15 = vpop.f32.mrb[0].mxu0 }
  0xf2   :  { %v115_v16 = vadd.f32 %v250_v14, %v114_v15  ;;  %v267_v18 = vpop.f32.mrb[1].mxu0 }
  0xf4   :  { %v118_v19 = vmax.f32 %v115_v16, 0.0 }
  0xf6   :  { %v128_v20 = vcombine.high %v118_v19, %v118_v19  ;;  %v135_v21 = vrot.slane %v118_v19, %v134_v17 }
  0xf8   :  { %v142_v23 = vrot.slane %v128_v20, %v134_v17  ;;  %v143_v24 = vcombine.high %v135_v21, %v135_v21  ;;  %v151_v25 = vrot.slane %v135_v21, %v134_v17 }
  0xfa   :  { %v144_v27 = vcombine.high %v142_v23, %v142_v23  ;;  %v158_v28 = vrot.slane %v142_v23, %v134_v17  ;;  %v165_v29 = vrot.slane %v143_v24, %v134_v17  ;;  %v173_v30 = vcombine.high %v151_v25, %v151_v25 }
  0xfb   :  { %v180_v31 = vrot.slane %v151_v25, %v179_v22 }
  0xfc   :  { %v172_v35 = vrot.slane %v144_v27, %v134_v17  ;;  %v174_v36 = vcombine.high %v158_v28, %v158_v28  ;;  %v175_v37 = vcombine.high %v165_v29, %v165_v29  ;;  %v184_v38 = vrot.slane %v165_v29, %v179_v22 }
  0xfd   :  { %v188_v42 = vrot.slane %v173_v30, %v179_v22  ;;  %v196_v43 = vrot.slane %v158_v28, %v179_v22  ;;  %v217_v44 = vadd.f32 %v180_v31, %v119_v26 }
  0xfe   :  { %v176_v45 = vcombine.high %v172_v35, %v172_v35  ;;  %v192_v46 = vrot.slane %v175_v37, %v179_v22  ;;  %v200_v47 = vrot.slane %v172_v35, %v179_v22  ;;  %v204_v48 = vrot.slane %v174_v36, %v179_v22 }
  0xff   :  { %v218_v50 = vadd.f32 %v184_v38, %v120_v32  ;;  %v219_v51 = vadd.f32 %v188_v42, %v121_v33  ;;  %v221_v52 = vadd.f32 %v196_v43, %v123_v34  ;;  %225 = vst [vmem:[#allocation5] sm:$0xff] %v217_v44 }
 0x100   :  { %v208_v53 = vrot.slane %v176_v45, %v179_v22  ;;  %v220_v54 = vadd.f32 %v192_v46, %v122_v39  ;;  %v222_v55 = vadd.f32 %v200_v47, %v124_v40  ;;  %v223_v56 = vadd.f32 %v204_v48, %v125_v41 }
 0x101   :  { %226 = vst [vmem:[#allocation5 + $0x8] sm:$0xff] %v218_v50  ;;  %227 = vst [vmem:[#allocation5 + $0x10] sm:$0xff] %v219_v51 }
 0x102   :  { %229 = vst [vmem:[#allocation5 + $0x20] sm:$0xff] %v221_v52  ;;  %v224_v57 = vadd.f32 %v208_v53, %v126_v49  ;;  %228 = vst [vmem:[#allocation5 + $0x18] sm:$0xff] %v220_v54 }
 0x103   :  { %230 = vst [vmem:[#allocation5 + $0x28] sm:$0xff] %v222_v55  ;;  %231 = vst [vmem:[#allocation5 + $0x30] sm:$0xff] %v223_v56 }
 0x104   :  { %232 = vst [vmem:[#allocation5 + $0x38] sm:$0xff] %v224_v57 }
 0x105   :  { %315 = shalt.err (!%p312_p12)
}
 0x106   :  { %s316_s16 = scalar_lea.hbm %s415_s4, 1024 }
 0x107   :  { %p317_p13 = scmp.ne.s32.totalorder %s415_s4, %s316_s16  ;;  %p320_p0 = scmp.lt.u32.totalorder %s316_s16, %s415_s4 }
 0x109   :  { %p322_p1 = pnand %p320_p0, %p317_p13 }
 0x10b   :  { %325 = shalt.err (!%p322_p1)
}
 0x10c   :  { %244 = dma.vmem_to_hbm [thread:$0]  %s239_s1, 1024, %s415_s4, [#allocation4], %s331_s25, %s331_s25, %s332_s26  }
 0x10d   :  { %328 = dma.done.wait [#allocation4], 1024  }
 0x10e   :  { %329 = vsyncadd [#allocation4], 4294966272 }
 0x10f   :  { %248 = vsyncpa [#allocation3], 1 }
 0x110   :  { %249 = vsyncpa [#allocation4], 1 }

</bundles_post_ra>
